<compile_context>
chip_gen: v6e
topology: v6e:2x2x1
jax: 0.10.0
libtpu: 0.0.40
codegen_flags: <defaults>
</compile_context>

<pallas_src>
import functools

import jax
import jax.numpy as jnp
from jax import lax
from jax.experimental import pallas as pl
from jax.experimental.pallas import tpu as pltpu

OUT_LANES = 128  # lane-dense output width (>= k); unused lanes hold exact 0


def _triplet_kernel(x_ref, t_ref, loss_ref, *, margin, k, mult,
                    apply_softmax, tau):
    x = x_ref[...].astype(jnp.float32)                      # (tb, N) similarities
    tb, n = x.shape
    base = pl.program_id(0) * tb                            # global row offset

    col_ids = lax.broadcasted_iota(jnp.int32, (tb, n), 1)

    # sim_p = diagonal(input).view(-1, 1): column index == global row index.
    diag_col = lax.broadcasted_iota(jnp.int32, (tb, 1), 0) + base
    sim_p = jnp.sum(jnp.where(col_ids == diag_col, x, 0.0), axis=1,
                    keepdims=True)                          # (tb, 1)

    # similarities = min(input, 1 - target); target is dead after this line.
    sims = jnp.minimum(x, 1.0 - t_ref[...].astype(jnp.float32))

    # Iterative exact top-k (largest first, first-index tie-break, matching
    # lax.top_k / torch.topk), gathering the *input* value at each index (OHNM).
    # TODO(synk): v7x-only 2-reduce packed top-k (value|index in one sort key)
    # intentionally left out to preserve exact tie-breaking; 3 lane-reduces/k.
    neg_inf = jnp.float32(-jnp.inf)
    big_col = jnp.int32(n)
    sim_n_cols = []
    for _ in range(k):
        cur_max = jnp.max(sims, axis=1, keepdims=True)                   # (tb,1)
        is_max = sims == cur_max
        idx = jnp.min(jnp.where(is_max, col_ids, big_col), axis=1,
                      keepdims=True)                                     # first argmax
        sel = col_ids == idx                                             # one-hot
        sim_n_cols.append(jnp.sum(jnp.where(sel, x, 0.0), axis=1,
                                  keepdims=True))                        # input[., idx]
        sims = jnp.where(sel, neg_inf, sims)                             # knock out

    # loss = max(0, sim_n - sim_p + margin), one (tb,1) column per negative
    loss_cols = [jnp.maximum(0.0, c - sim_p + margin) for c in sim_n_cols]

    if apply_softmax:
        sim_n = jnp.concatenate(sim_n_cols, axis=1)                      # (tb,k)
        loss = jnp.concatenate(loss_cols, axis=1)
        logits = (sim_n / tau) * (loss != 0.0).astype(jnp.float32)
        m = jnp.max(logits, axis=1, keepdims=True)
        e = jnp.exp(logits - m)
        prob = e * pl.reciprocal(jnp.sum(e, axis=1, keepdims=True), approx=False)
        loss = loss * prob
        loss_cols = [loss[:, j:j + 1] for j in range(k)]

    # loss = log(1 + exp(pairwise_multiplier * loss)), numerically-stable
    # softplus, written directly into lanes [0, k); lanes >= k stay exact 0 so
    # the wrapper's mean is just sum(out) / (B * k).
    out_cols = lax.broadcasted_iota(jnp.int32, (tb, OUT_LANES), 1)
    out = jnp.zeros((tb, OUT_LANES), jnp.float32)
    for j, lc in enumerate(loss_cols):
        z = mult * lc
        sp = jnp.where(z > 20.0, z,
                       jnp.log(1.0 + jnp.exp(jnp.minimum(z, 20.0))))
        out = jnp.where(out_cols == j, sp, out)
    loss_ref[...] = out

    # TODO(synk): num_random_negs>0 path (torch.randperm negative subsampling)
    # and the num_violators statistic are not implemented (off by default).


def _vmem_capacity_bytes():
    try:
        cap = getattr(pltpu.get_tpu_info(), "vmem_capacity_bytes", None)
        if cap:
            return int(cap)
    except Exception:
        pass
    return 64 * 2**20              # conservative: v7x per-TensorCore VMEM


def _choose_tile_b(B, N, in_bytes, tgt_bytes):
    """Largest row tile whose pipeline buffers + live temporaries fit VMEM."""
    # 2 pipeline buffers per input stream + ~4 live full-tile f32/i32 arrays
    # (x, sims, col_ids, one temp) + the double-buffered (tb, 128) output.
    per_row = N * (2 * (in_bytes + tgt_bytes) + 16) + 2 * OUT_LANES * 4
    budget = min(40 * 2**20, (_vmem_capacity_bytes() * 3) // 5)
    tb = budget // max(per_row, 1)
    tb = max(32, min(tb, 4096))
    tb = (tb // 32) * 32           # int8 sublane packing: 32 rows per tile
    if tb >= B:
        if B <= 64:
            return B               # tiny input: one full-array block
        tb = ((B + 1) // 2 + 31) // 32 * 32   # >= 2 tiles: both v7x TCs busy
    return tb


@functools.partial(jax.jit,
                   static_argnames=("margin", "k", "mult", "apply_softmax", "tau"))
def logistic_triplet_margin_loss_ohnm(inp, target, *, margin=0.8, k=3,
                                      mult=5.0, apply_softmax=False, tau=0.1):
    """Returns (mean-reduced loss scalar, per-pair loss[B, k]).

    `inp` / `target` are streamed in the caller's dtypes (no wrapper-side
    astype/pad HBM passes); int8 targets and bf16 inputs reduce HBM traffic,
    casts happen on load inside the kernel.
    """
    B, N = inp.shape
    assert target.shape == (B, N)
    assert B <= N, "diagonal ground-truth (torch.diagonal) requires batch <= output_size"
    k = min(int(k), N)

    in_bytes = jnp.dtype(inp.dtype).itemsize
    tgt_bytes = jnp.dtype(target.dtype).itemsize
    tile_b = _choose_tile_b(B, N, in_bytes, tgt_bytes)
    num_tiles = pl.cdiv(B, tile_b)

    kernel = functools.partial(_triplet_kernel, margin=float(margin), k=int(k),
                               mult=float(mult),
                               apply_softmax=bool(apply_softmax), tau=float(tau))

    vmem_cap = _vmem_capacity_bytes()
    pipe_bytes = 2 * tile_b * (N * (in_bytes + tgt_bytes) + OUT_LANES * 4)
    work_bytes = tile_b * N * 16
    vmem_limit = int(min(vmem_cap - 8 * 2**20,            # v7x: never > 56 MiB
                         max(32 * 2**20, pipe_bytes + work_bytes + 4 * 2**20)))

    cost = pl.CostEstimate(
        flops=int((5 * k + 8) * B * N),
        transcendentals=int(2 * B * k),
        bytes_accessed=int(B * N * (in_bytes + tgt_bytes) + B * OUT_LANES * 4),
    )

    out = pl.pallas_call(
        kernel,
        out_shape=jax.ShapeDtypeStruct((B, OUT_LANES), jnp.float32),
        grid=(num_tiles,),
        in_specs=[pl.BlockSpec((tile_b, N), lambda i: (i, 0)),
                  pl.BlockSpec((tile_b, N), lambda i: (i, 0))],
        out_specs=pl.BlockSpec((tile_b, OUT_LANES), lambda i: (i, 0)),
        compiler_params=pltpu.CompilerParams(
            dimension_semantics=("parallel",),
            vmem_limit_bytes=vmem_limit),
        cost_estimate=cost,
    )(inp, target)

    # reduction='mean': lanes >= k hold exact zeros, so the mean over the k
    # valid pairs is sum(out) / (B * k) -- no extra slicing pass over big data.
    red = jnp.sum(out) / (B * k)
    per_pair = out[:, :k]
    return red, per_pair


def _reference(inp, target, margin=0.8, k=3, mult=5.0):
    # Pure-JAX reference mirroring the PyTorch forward (default flags).
    sim_p = jnp.diagonal(inp).reshape(-1, 1)
    sims = jnp.minimum(inp, 1.0 - target)
    k = min(k, inp.shape[1])
    _, idx = lax.top_k(sims, k)
    sim_n = jnp.take_along_axis(inp, idx, axis=1)
    loss = jnp.maximum(0.0, sim_n - sim_p + margin)
    loss = jnp.log(1.0 + jnp.exp(mult * loss))
    return jnp.mean(loss), loss


if __name__ == "__main__":
    key = jax.random.PRNGKey(0)
    B, N = 8, 16  # batch_size x output_size (diagonal entries are ground truth)

    k1, k2 = jax.random.split(key)
    # cosine-similarity-like predictions in [-1, 1]
    inp = jax.random.uniform(k1, (B, N), minval=-1.0, maxval=1.0,
                             dtype=jnp.float32)
    # 0/1 targets streamed as int8 (exact, 1/4 the bytes of f32):
    # diagonal positives plus a few random extra positives
    eye = jnp.arange(B)[:, None] == jnp.arange(N)[None, :]
    extra = jax.random.uniform(k2, (B, N)) < 0.1
    target_i8 = (eye | extra).astype(jnp.int8)

    red, per_pair = logistic_triplet_margin_loss_ohnm(inp, target_i8)
    red = jax.block_until_ready(red)
    per_pair = jax.block_until_ready(per_pair)

    ref_red, ref_loss = _reference(inp, target_i8.astype(jnp.float32))
    assert jnp.allclose(red, ref_red, atol=1e-5, rtol=1e-5), (red, ref_red)
    assert jnp.allclose(per_pair, ref_loss, atol=1e-5, rtol=1e-5)

    print("KERNEL_OK")
</pallas_src>

<mosaic_0001>
module attributes {stable_mosaic.version = 11 : i64} {
  func.func @_triplet_kernel(%arg0: i32, %arg1: memref<8x16xf32, #tpu.memory_space<vmem>>, %arg2: memref<8x16xi8, #tpu.memory_space<vmem>>, %arg3: memref<8x128xf32, #tpu.memory_space<vmem>>) attributes {dimension_semantics = [#tpu.dimension_semantics<parallel>], iteration_bounds = array<i64: 1>, scalar_prefetch = 0 : i64, scratch_operands = 0 : i64, tpu.core_type = #tpu.core_type<tc>, window_params = [{transform_indices = @transform_0, window_bounds = array<i64: 8, 16>}, {transform_indices = @transform_1, window_bounds = array<i64: 8, 16>}, {transform_indices = @transform_2, window_bounds = array<i64: 8, 128>}]} {
    %c0 = arith.constant 0 : index
    %c0_0 = arith.constant 0 : index
    %0 = vector.load %arg1[%c0, %c0_0] : memref<8x16xf32, #tpu.memory_space<vmem>>, vector<8x16xf32>
    %c8_i32 = arith.constant 8 : i32
    %1 = arith.muli %arg0, %c8_i32 : i32
    %2 = tpu.iota {dimensions = array<i32: 1>} : vector<8x16xi32>
    %3 = tpu.iota {dimensions = array<i32: 0>} : vector<8x1xi32>
    %4 = vector.broadcast %1 : i32 to vector<8x1xi32>
    %5 = arith.addi %3, %4 : vector<8x1xi32>
    %6 = vector.broadcast %5 : vector<8x1xi32> to vector<8x16xi32>
    %7 = arith.cmpi eq, %2, %6 : vector<8x16xi32>
    %cst = arith.constant 0.000000e+00 : f32
    %8 = vector.broadcast %cst : f32 to vector<8x16xf32>
    %9 = arith.select %7, %0, %8 : vector<8x16xi1>, vector<8x16xf32>
    %cst_1 = arith.constant dense<0.000000e+00> : vector<8xf32>
    %10 = vector.multi_reduction <add>, %9, %cst_1 [1] : vector<8x16xf32> to vector<8xf32>
    %11 = vector.shape_cast %10 : vector<8xf32> to vector<8x1xf32>
    %c0_2 = arith.constant 0 : index
    %c0_3 = arith.constant 0 : index
    %12 = vector.load %arg2[%c0_2, %c0_3] : memref<8x16xi8, #tpu.memory_space<vmem>>, vector<8x16xi8>
    %13 = arith.sitofp %12 : vector<8x16xi8> to vector<8x16xf32>
    %cst_4 = arith.constant 1.000000e+00 : f32
    %14 = vector.broadcast %cst_4 : f32 to vector<8x16xf32>
    %15 = arith.subf %14, %13 : vector<8x16xf32>
    %16 = arith.minimumf %0, %15 : vector<8x16xf32>
    %cst_5 = arith.constant dense<0xFF800000> : vector<8xf32>
    %17 = vector.multi_reduction <maximumf>, %16, %cst_5 [1] : vector<8x16xf32> to vector<8xf32>
    %18 = vector.shape_cast %17 : vector<8xf32> to vector<8x1xf32>
    %19 = vector.broadcast %18 : vector<8x1xf32> to vector<8x16xf32>
    %20 = arith.cmpf oeq, %16, %19 : vector<8x16xf32>
    %c16_i32 = arith.constant 16 : i32
    %21 = vector.broadcast %c16_i32 : i32 to vector<8x16xi32>
    %22 = arith.select %20, %2, %21 : vector<8x16xi1>, vector<8x16xi32>
    %cst_6 = arith.constant dense<2147483647> : vector<8xi32>
    %23 = vector.multi_reduction <minsi>, %22, %cst_6 [1] : vector<8x16xi32> to vector<8xi32>
    %24 = vector.shape_cast %23 : vector<8xi32> to vector<8x1xi32>
    %25 = vector.broadcast %24 : vector<8x1xi32> to vector<8x16xi32>
    %26 = arith.cmpi eq, %2, %25 : vector<8x16xi32>
    %cst_7 = arith.constant 0.000000e+00 : f32
    %27 = vector.broadcast %cst_7 : f32 to vector<8x16xf32>
    %28 = arith.select %26, %0, %27 : vector<8x16xi1>, vector<8x16xf32>
    %cst_8 = arith.constant dense<0.000000e+00> : vector<8xf32>
    %29 = vector.multi_reduction <add>, %28, %cst_8 [1] : vector<8x16xf32> to vector<8xf32>
    %30 = vector.shape_cast %29 : vector<8xf32> to vector<8x1xf32>
    %cst_9 = arith.constant 0xFF800000 : f32
    %31 = vector.broadcast %cst_9 : f32 to vector<8x16xf32>
    %32 = arith.select %26, %31, %16 : vector<8x16xi1>, vector<8x16xf32>
    %cst_10 = arith.constant dense<0xFF800000> : vector<8xf32>
    %33 = vector.multi_reduction <maximumf>, %32, %cst_10 [1] : vector<8x16xf32> to vector<8xf32>
    %34 = vector.shape_cast %33 : vector<8xf32> to vector<8x1xf32>
    %35 = vector.broadcast %34 : vector<8x1xf32> to vector<8x16xf32>
    %36 = arith.cmpf oeq, %32, %35 : vector<8x16xf32>
    %c16_i32_11 = arith.constant 16 : i32
    %37 = vector.broadcast %c16_i32_11 : i32 to vector<8x16xi32>
    %38 = arith.select %36, %2, %37 : vector<8x16xi1>, vector<8x16xi32>
    %cst_12 = arith.constant dense<2147483647> : vector<8xi32>
    %39 = vector.multi_reduction <minsi>, %38, %cst_12 [1] : vector<8x16xi32> to vector<8xi32>
    %40 = vector.shape_cast %39 : vector<8xi32> to vector<8x1xi32>
    %41 = vector.broadcast %40 : vector<8x1xi32> to vector<8x16xi32>
    %42 = arith.cmpi eq, %2, %41 : vector<8x16xi32>
    %cst_13 = arith.constant 0.000000e+00 : f32
    %43 = vector.broadcast %cst_13 : f32 to vector<8x16xf32>
    %44 = arith.select %42, %0, %43 : vector<8x16xi1>, vector<8x16xf32>
    %cst_14 = arith.constant dense<0.000000e+00> : vector<8xf32>
    %45 = vector.multi_reduction <add>, %44, %cst_14 [1] : vector<8x16xf32> to vector<8xf32>
    %46 = vector.shape_cast %45 : vector<8xf32> to vector<8x1xf32>
    %cst_15 = arith.constant 0xFF800000 : f32
    %47 = vector.broadcast %cst_15 : f32 to vector<8x16xf32>
    %48 = arith.select %42, %47, %32 : vector<8x16xi1>, vector<8x16xf32>
    %cst_16 = arith.constant dense<0xFF800000> : vector<8xf32>
    %49 = vector.multi_reduction <maximumf>, %48, %cst_16 [1] : vector<8x16xf32> to vector<8xf32>
    %50 = vector.shape_cast %49 : vector<8xf32> to vector<8x1xf32>
    %51 = vector.broadcast %50 : vector<8x1xf32> to vector<8x16xf32>
    %52 = arith.cmpf oeq, %48, %51 : vector<8x16xf32>
    %c16_i32_17 = arith.constant 16 : i32
    %53 = vector.broadcast %c16_i32_17 : i32 to vector<8x16xi32>
    %54 = arith.select %52, %2, %53 : vector<8x16xi1>, vector<8x16xi32>
    %cst_18 = arith.constant dense<2147483647> : vector<8xi32>
    %55 = vector.multi_reduction <minsi>, %54, %cst_18 [1] : vector<8x16xi32> to vector<8xi32>
    %56 = vector.shape_cast %55 : vector<8xi32> to vector<8x1xi32>
    %57 = vector.broadcast %56 : vector<8x1xi32> to vector<8x16xi32>
    %58 = arith.cmpi eq, %2, %57 : vector<8x16xi32>
    %cst_19 = arith.constant 0.000000e+00 : f32
    %59 = vector.broadcast %cst_19 : f32 to vector<8x16xf32>
    %60 = arith.select %58, %0, %59 : vector<8x16xi1>, vector<8x16xf32>
    %cst_20 = arith.constant dense<0.000000e+00> : vector<8xf32>
    %61 = vector.multi_reduction <add>, %60, %cst_20 [1] : vector<8x16xf32> to vector<8xf32>
    %62 = vector.shape_cast %61 : vector<8xf32> to vector<8x1xf32>
    %63 = arith.subf %30, %11 : vector<8x1xf32>
    %cst_21 = arith.constant 8.000000e-01 : f32
    %64 = vector.broadcast %cst_21 : f32 to vector<8x1xf32>
    %65 = arith.addf %63, %64 : vector<8x1xf32>
    %cst_22 = arith.constant 0.000000e+00 : f32
    %66 = vector.broadcast %cst_22 : f32 to vector<8x1xf32>
    %67 = arith.maximumf %66, %65 : vector<8x1xf32>
    %68 = arith.subf %46, %11 : vector<8x1xf32>
    %cst_23 = arith.constant 8.000000e-01 : f32
    %69 = vector.broadcast %cst_23 : f32 to vector<8x1xf32>
    %70 = arith.addf %68, %69 : vector<8x1xf32>
    %cst_24 = arith.constant 0.000000e+00 : f32
    %71 = vector.broadcast %cst_24 : f32 to vector<8x1xf32>
    %72 = arith.maximumf %71, %70 : vector<8x1xf32>
    %73 = arith.subf %62, %11 : vector<8x1xf32>
    %cst_25 = arith.constant 8.000000e-01 : f32
    %74 = vector.broadcast %cst_25 : f32 to vector<8x1xf32>
    %75 = arith.addf %73, %74 : vector<8x1xf32>
    %cst_26 = arith.constant 0.000000e+00 : f32
    %76 = vector.broadcast %cst_26 : f32 to vector<8x1xf32>
    %77 = arith.maximumf %76, %75 : vector<8x1xf32>
    %78 = tpu.iota {dimensions = array<i32: 1>} : vector<8x128xi32>
    %cst_27 = arith.constant 0.000000e+00 : f32
    %79 = vector.broadcast %cst_27 : f32 to vector<8x128xf32>
    %cst_28 = arith.constant 5.000000e+00 : f32
    %80 = vector.broadcast %cst_28 : f32 to vector<8x1xf32>
    %81 = arith.mulf %80, %67 : vector<8x1xf32>
    %cst_29 = arith.constant 2.000000e+01 : f32
    %82 = vector.broadcast %cst_29 : f32 to vector<8x1xf32>
    %83 = arith.cmpf ogt, %81, %82 : vector<8x1xf32>
    %cst_30 = arith.constant 2.000000e+01 : f32
    %84 = vector.broadcast %cst_30 : f32 to vector<8x1xf32>
    %85 = arith.minimumf %81, %84 : vector<8x1xf32>
    %86 = math.exp %85 : vector<8x1xf32>
    %cst_31 = arith.constant 1.000000e+00 : f32
    %87 = vector.broadcast %cst_31 : f32 to vector<8x1xf32>
    %88 = arith.addf %87, %86 : vector<8x1xf32>
    %89 = math.log %88 : vector<8x1xf32>
    %90 = arith.select %83, %81, %89 : vector<8x1xi1>, vector<8x1xf32>
    %c0_i32 = arith.constant 0 : i32
    %91 = vector.broadcast %c0_i32 : i32 to vector<8x128xi32>
    %92 = arith.cmpi eq, %78, %91 : vector<8x128xi32>
    %93 = vector.shape_cast %90 : vector<8x1xf32> to vector<8x1xf32>
    %94 = vector.broadcast %93 : vector<8x1xf32> to vector<8x128xf32>
    %95 = arith.select %92, %94, %79 : vector<8x128xi1>, vector<8x128xf32>
    %cst_32 = arith.constant 5.000000e+00 : f32
    %96 = vector.broadcast %cst_32 : f32 to vector<8x1xf32>
    %97 = arith.mulf %96, %72 : vector<8x1xf32>
    %cst_33 = arith.constant 2.000000e+01 : f32
    %98 = vector.broadcast %cst_33 : f32 to vector<8x1xf32>
    %99 = arith.cmpf ogt, %97, %98 : vector<8x1xf32>
    %cst_34 = arith.constant 2.000000e+01 : f32
    %100 = vector.broadcast %cst_34 : f32 to vector<8x1xf32>
    %101 = arith.minimumf %97, %100 : vector<8x1xf32>
    %102 = math.exp %101 : vector<8x1xf32>
    %cst_35 = arith.constant 1.000000e+00 : f32
    %103 = vector.broadcast %cst_35 : f32 to vector<8x1xf32>
    %104 = arith.addf %103, %102 : vector<8x1xf32>
    %105 = math.log %104 : vector<8x1xf32>
    %106 = arith.select %99, %97, %105 : vector<8x1xi1>, vector<8x1xf32>
    %c1_i32 = arith.constant 1 : i32
    %107 = vector.broadcast %c1_i32 : i32 to vector<8x128xi32>
    %108 = arith.cmpi eq, %78, %107 : vector<8x128xi32>
    %109 = vector.shape_cast %106 : vector<8x1xf32> to vector<8x1xf32>
    %110 = vector.broadcast %109 : vector<8x1xf32> to vector<8x128xf32>
    %111 = arith.select %108, %110, %95 : vector<8x128xi1>, vector<8x128xf32>
    %cst_36 = arith.constant 5.000000e+00 : f32
    %112 = vector.broadcast %cst_36 : f32 to vector<8x1xf32>
    %113 = arith.mulf %112, %77 : vector<8x1xf32>
    %cst_37 = arith.constant 2.000000e+01 : f32
    %114 = vector.broadcast %cst_37 : f32 to vector<8x1xf32>
    %115 = arith.cmpf ogt, %113, %114 : vector<8x1xf32>
    %cst_38 = arith.constant 2.000000e+01 : f32
    %116 = vector.broadcast %cst_38 : f32 to vector<8x1xf32>
    %117 = arith.minimumf %113, %116 : vector<8x1xf32>
    %118 = math.exp %117 : vector<8x1xf32>
    %cst_39 = arith.constant 1.000000e+00 : f32
    %119 = vector.broadcast %cst_39 : f32 to vector<8x1xf32>
    %120 = arith.addf %119, %118 : vector<8x1xf32>
    %121 = math.log %120 : vector<8x1xf32>
    %122 = arith.select %115, %113, %121 : vector<8x1xi1>, vector<8x1xf32>
    %c2_i32 = arith.constant 2 : i32
    %123 = vector.broadcast %c2_i32 : i32 to vector<8x128xi32>
    %124 = arith.cmpi eq, %78, %123 : vector<8x128xi32>
    %125 = vector.shape_cast %122 : vector<8x1xf32> to vector<8x1xf32>
    %126 = vector.broadcast %125 : vector<8x1xf32> to vector<8x128xf32>
    %127 = arith.select %124, %126, %111 : vector<8x128xi1>, vector<8x128xf32>
    %c0_40 = arith.constant 0 : index
    %c0_41 = arith.constant 0 : index
    %128 = vector.load %arg3[%c0_40, %c0_41] : memref<8x128xf32, #tpu.memory_space<vmem>>, vector<8x128xf32>
    tpu.vector_store %arg3[%c0_40, %c0_41], %127 {strides = array<i32>} : memref<8x128xf32, #tpu.memory_space<vmem>>, vector<8x128xf32>,
    return
  }
  func.func @transform_0(%arg0: i32) -> (i32, i32) {
    %c0_i32 = arith.constant 0 : i32
    %c0_i32_0 = arith.constant 0 : i32
    return %arg0, %c0_i32 : i32, i32
  }
  func.func @transform_1(%arg0: i32) -> (i32, i32) {
    %c0_i32 = arith.constant 0 : i32
    %c0_i32_0 = arith.constant 0 : i32
    return %arg0, %c0_i32 : i32, i32
  }
  func.func @transform_2(%arg0: i32) -> (i32, i32) {
    %c0_i32 = arith.constant 0 : i32
    %c0_i32_0 = arith.constant 0 : i32
    return %arg0, %c0_i32 : i32, i32
  }
}

</mosaic_0001>

<bundles_post_ra>
// kernel: logistic_triplet_margin_loss_ohnm.1
= control target key start
LH: loop header
LB: loop body
LE: loop exit
PB: predicated region body
PF: predicated region fallthrough
CT: control target
= control target key end

     0   :  { %7 = vsyncpa [#allocation3], 0  ;;  %s301_s0 = inlined_call_operand.hbm [shape: f32[8,16], index: 0, kind: input, shape index: {}]   ;;  %s302_s1 = inlined_call_operand.hbm [shape: s8[8,16], index: 1, kind: input, shape index: {}]   ;;  %s303_s2 = inlined_call_operand.vmem [shape: f32[8,128], index: 2, kind: output, shape index: {}]  }
   0x1   :  { %8 = vsyncpa [#allocation5], 0  ;;  %s238_s9 = smov [#allocation2]   ;;  %s239_s11 = smov [#allocation4]  }
   0x2   :  { %s15_s10 = sshll.u32 %s238_s9, 4  ;;  %s25_s12 = sshll.u32 %s239_s11, 4  ;;  %s16_s10 = int_to_ptr.vmem [resolvable:$true] %s15_s10  ;;  %s26_s12 = int_to_ptr.vmem [resolvable:$true] %s25_s12 }
   0x3   :  { %s202_s13 = scalar_lea.vmem %s16_s10, 128  ;;  %p207_p1 = scmp.lt.s32.totalorder %s16_s10, %s16_s10 }
   0x4   :  { %p203_p0 = scmp.ne.s32.totalorder %s16_s10, %s202_s13  ;;  %p208_p2 = scmp.lt.s32.totalorder %s202_s13, %s202_s13 }
   0x6   :  { %p209_p3 = por %p208_p2, %p207_p1 }
   0x8   :  { %p210_p4 = pnand %p209_p3, %p203_p0 }
   0xa   :  { %213 = shalt.err (!%p210_p4)
}
   0xb   :  { %18 = dma.hbm_to_vmem [thread:$0]  %s301_s0, 128, %s16_s10, [#allocation3]  }
   0xc   :  { %s222_s16 = scalar_lea.vmem %s26_s12, 32  ;;  %p227_p6 = scmp.lt.s32.totalorder %s26_s12, %s26_s12 }
   0xd   :  { %p223_p5 = scmp.ne.s32.totalorder %s26_s12, %s222_s16  ;;  %p228_p7 = scmp.lt.s32.totalorder %s222_s16, %s222_s16 }
   0xf   :  { %p229_p8 = por %p228_p7, %p227_p6 }
  0x11   :  { %p230_p9 = pnand %p229_p8, %p223_p5 }
  0x13   :  { %233 = shalt.err (!%p230_p9)
}
  0x14   :  { %28 = dma.hbm_to_vmem [thread:$0]  %s302_s1, 32, %s26_s12, [#allocation5]  }
  0x15   :  { %234 = dma.done.wait [#allocation3], 128  }
  0x16   :  { %235 = vsyncadd [#allocation3], 4294967168 }
  0x17   :  { %236 = dma.done.wait [#allocation5], 32  }
  0x18   :  { %237 = vsyncadd [#allocation5], 4294967264  ;;  %v49_v0 = vld [vmem:[#allocation4] sm:$0x3]  ;;  %v261_v3 = vld [vmem:[#allocation2] sm:$0xff]  ;;  %vm45_vm0 = vcmask 130048   ;;  %v37_v7 = vlaneseq }
  0x19   :  { %v50_v1 = vunpack.c.0.s8 %v49_v0 }
  0x1a   :  { %v265_v8 = vand.u32 127, %v37_v7  ;;  %v40_v41 = vshrl.u32 %v37_v7, 7 }
  0x1b   :  { %v51_v2 = vcvt.s32.f32 %v50_v1 }
  0x1c   :  { %vm43_vm8 = vcmp.eq.s32.totalorder %v265_v8, %v40_v41  ;;  %vm149_vm12 = vcmp.eq.s32.totalorder %v265_v8, 0  ;;  %vm160_vm13 = vcmp.eq.s32.totalorder %v265_v8, 1  ;;  %vm171_vm15 = vcmp.eq.s32.totalorder %v265_v8, 2 }
  0x1d   :  { %v52_v4 = vsub.f32 1.0, %v51_v2  ;;  %v44_v47 = vsel %vm43_vm8, %v261_v3, 0.0 }
  0x1e   :  { %v46_v48 = vsel %vm45_vm0, %v44_v47, 0.0 }
  0x1f   :  { %v53_v5 = vmin.f32 %v261_v3, %v52_v4 }
  0x21   :  { %v54_v6 = vsel %vm45_vm0, %v53_v5, -inf }
  0x22   :  { %55 = vmax.xlane.f32.xlu0 %v54_v6 }
  0xab   :  { %v56_v9 = vpop.xlane.xlu0 %55 }
  0xac   :  { %vm57_vm1 = vcmp.eq.f32.partialorder %v53_v5, %v56_v9 }
  0xad   :  { %v58_v10 = vsel %vm57_vm1, %v265_v8, 16 }
  0xae   :  { %v59_v11 = vsel %vm45_vm0, %v58_v10, 2147483647 }
  0xaf   :  { %v61_v12 = vshra.s32 %v59_v11, 16  ;;  %v60_v14 = vand.u32 65535, %v59_v11 }
  0xb1   :  { %v63_v13 = vcvt.s32.f32 %v61_v12  ;;  %v62_v16 = vcvt.s32.f32 %v60_v14 }
  0xb3   :  { %64 = vmin.xlane.f32.xlu0 %v63_v13 }
 0x13c   :  { %v65_v15 = vpop.xlane.xlu0 %64 }
 0x13d   :  { %vm66_vm2 = vcmp.eq.f32.partialorder %v63_v13, %v65_v15  ;;  %v71_v18 = vcvt.f32.s32 %v65_v15 }
 0x13e   :  { %v67_v17 = vsel %vm66_vm2, %v62_v16, inf }
 0x13f   :  { %68 = vmin.xlane.f32.xlu1 %v67_v17  ;;  %v72_v20 = vshll.u32 %v71_v18, 16 }
 0x1c8   :  { %v69_v19 = vpop.xlane.xlu1 %68 }
 0x1c9   :  { %v70_v21 = vcvt.f32.s32 %v69_v19 }
 0x1cb   :  { %v73_v22 = vadd.s32 %v72_v20, %v70_v21 }
 0x1cd   :  { %vm74_vm3 = vcmp.eq.s32.totalorder %v265_v8, %v73_v22 }
 0x1ce   :  { %v79_v23 = vsel %vm74_vm3, -inf, %v53_v5  ;;  %v75_v55 = vsel %vm74_vm3, %v261_v3, 0.0 }
 0x1cf   :  { %v80_v24 = vsel %vm45_vm0, %v79_v23, -inf  ;;  %v76_v56 = vsel %vm45_vm0, %v75_v55, 0.0 }
 0x1d0   :  { %81 = vmax.xlane.f32.xlu1 %v80_v24 }
 0x259   :  { %v82_v25 = vpop.xlane.xlu1 %81 }
 0x25a   :  { %vm83_vm4 = vcmp.eq.f32.partialorder %v79_v23, %v82_v25 }
 0x25b   :  { %v84_v26 = vsel %vm83_vm4, %v265_v8, 16 }
 0x25c   :  { %v85_v27 = vsel %vm45_vm0, %v84_v26, 2147483647 }
 0x25d   :  { %v87_v28 = vshra.s32 %v85_v27, 16  ;;  %v86_v30 = vand.u32 65535, %v85_v27 }
 0x25f   :  { %v89_v29 = vcvt.s32.f32 %v87_v28  ;;  %v88_v32 = vcvt.s32.f32 %v86_v30 }
 0x261   :  { %90 = vmin.xlane.f32.xlu0 %v89_v29 }
 0x2ea   :  { %v91_v31 = vpop.xlane.xlu0 %90 }
 0x2eb   :  { %vm92_vm5 = vcmp.eq.f32.partialorder %v89_v29, %v91_v31  ;;  %v97_v34 = vcvt.f32.s32 %v91_v31 }
 0x2ec   :  { %v93_v33 = vsel %vm92_vm5, %v88_v32, inf }
 0x2ed   :  { %94 = vmin.xlane.f32.xlu1 %v93_v33  ;;  %v98_v36 = vshll.u32 %v97_v34, 16 }
 0x376   :  { %v95_v35 = vpop.xlane.xlu1 %94 }
 0x377   :  { %v96_v37 = vcvt.f32.s32 %v95_v35 }
 0x379   :  { %v99_v38 = vadd.s32 %v98_v36, %v96_v37 }
 0x37b   :  { %vm100_vm6 = vcmp.eq.s32.totalorder %v265_v8, %v99_v38 }
 0x37c   :  { %v105_v39 = vsel %vm100_vm6, -inf, %v79_v23  ;;  %v101_v49 = vsel %vm100_vm6, %v261_v3, 0.0 }
 0x37d   :  { %v106_v40 = vsel %vm45_vm0, %v105_v39, -inf  ;;  %v102_v50 = vsel %vm45_vm0, %v101_v49, 0.0 }
 0x37e   :  { %107 = vmax.xlane.f32.xlu0 %v106_v40 }
 0x407   :  { %v108_v42 = vpop.xlane.xlu0 %107 }
 0x408   :  { %vm109_vm7 = vcmp.eq.f32.partialorder %v105_v39, %v108_v42 }
 0x409   :  { %v110_v43 = vsel %vm109_vm7, %v265_v8, 16 }
 0x40a   :  { %v111_v44 = vsel %vm45_vm0, %v110_v43, 2147483647 }
 0x40b   :  { %v113_v45 = vshra.s32 %v111_v44, 16  ;;  %v112_v51 = vand.u32 65535, %v111_v44 }
 0x40d   :  { %v115_v46 = vcvt.s32.f32 %v113_v45  ;;  %v114_v53 = vcvt.s32.f32 %v112_v51 }
 0x40f   :  { %116 = vmin.xlane.f32.xlu1 %v115_v46 }
 0x413   :  { %47 = vadd.xlane.f32.xlu1 %v46_v48 }
 0x417   :  { %103 = vadd.xlane.f32.xlu1 %v102_v50 }
 0x498   :  { %v117_v52 = vpop.xlane.xlu1 %116 }
 0x499   :  { %vm118_vm9 = vcmp.eq.f32.partialorder %v115_v46, %v117_v52  ;;  %v123_v57 = vcvt.f32.s32 %v117_v52 }
 0x49a   :  { %v119_v54 = vsel %vm118_vm9, %v114_v53, inf }
 0x49b   :  { %120 = vmin.xlane.f32.xlu0 %v119_v54  ;;  %v124_v59 = vshll.u32 %v123_v57, 16 }
 0x49c   :  { %v48_v0 = vpop.xlane.xlu1 %47 }
 0x49f   :  { %77 = vadd.xlane.f32.xlu0 %v76_v56 }
 0x4a0   :  { %v104_v4 = vpop.xlane.xlu1 %103 }
 0x4a1   :  { %v134_v6 = vsub.f32 %v104_v4, %v48_v0 }
 0x4a3   :  { %v135_v9 = vadd.f32 0.8, %v134_v6 }
 0x4a5   :  { %v136_v11 = vmax.f32 %v135_v9, 0.0 }
 0x4a7   :  { %v151_v13 = vmul.f32 5.0, %v136_v11 }
 0x4a9   :  { %v153_v15 = vmin.f32 %v151_v13, 20.0  ;;  %vm152_vm14 = vcmp.gt.f32.partialorder %v151_v13, 20.0 }
 0x4ab   :  { %v154_v16 = vmul.f32 1.442695, %v153_v15 }
 0x524   :  { %v121_v58 = vpop.xlane.xlu0 %120 }
 0x525   :  { %v122_v60 = vcvt.f32.s32 %v121_v58 }
 0x527   :  { %v125_v61 = vadd.s32 %v124_v59, %v122_v60 }
 0x528   :  { %v78_v1 = vpop.xlane.xlu0 %77 }
 0x529   :  { %vm126_vm10 = vcmp.eq.s32.totalorder %v265_v8, %v125_v61  ;;  %v131_v2 = vsub.f32 %v78_v1, %v48_v0 }
 0x52a   :  { %v127_v62 = vsel %vm126_vm10, %v261_v3, 0.0 }
 0x52b   :  { %v128_v63 = vsel %vm45_vm0, %v127_v62, 0.0  ;;  %v132_v5 = vadd.f32 0.8, %v131_v2 }
 0x52c   :  { %129 = vadd.xlane.f32.xlu0 %v128_v63 }
 0x52d   :  { %v133_v7 = vmax.f32 %v132_v5, 0.0 }
 0x52f   :  { %v140_v10 = vmul.f32 5.0, %v133_v7 }
 0x531   :  { %v142_v12 = vmin.f32 %v140_v10, 20.0  ;;  %vm141_vm11 = vcmp.gt.f32.partialorder %v140_v10, 20.0 }
 0x533   :  { %v143_v14 = vmul.f32 1.442695, %v142_v12 }
 0x535   :  { %182 = vpow2.f32 %v143_v14 }
 0x536   :  { %184 = vpow2.f32 %v154_v16 }
 0x542   :  { %v183_v23 = vpop.eup %182 }
 0x543   :  { %v145_v24 = vadd.f32 1.0, %v183_v23  ;;  %v185_v25 = vpop.eup %184 }
 0x544   :  { %v156_v26 = vadd.f32 1.0, %v185_v25 }
 0x5b5   :  { %v130_v3 = vpop.xlane.xlu0 %129 }
 0x5b6   :  { %v137_v17 = vsub.f32 %v130_v3, %v48_v0 }
 0x5b8   :  { %v138_v18 = vadd.f32 0.8, %v137_v17 }
 0x5ba   :  { %v139_v19 = vmax.f32 %v138_v18, 0.0 }
 0x5bc   :  { %v162_v20 = vmul.f32 5.0, %v139_v19 }
 0x5be   :  { %v164_v21 = vmin.f32 %v162_v20, 20.0  ;;  %vm163_vm0 = vcmp.gt.f32.partialorder %v162_v20, 20.0 }
 0x5c0   :  { %v165_v22 = vmul.f32 1.442695, %v164_v21 }
 0x5c2   :  { %186 = vpow2.f32 %v165_v22 }
 0x5c3   :  { %188 = vlog2.f32 %v145_v24 }
 0x5c4   :  { %190 = vlog2.f32 %v156_v26 }
 0x5cf   :  { %v187_v27 = vpop.eup %186 }
 0x5d0   :  { %v167_v28 = vadd.f32 1.0, %v187_v27  ;;  %v189_v29 = vpop.eup %188 }
 0x5d1   :  { %v147_v30 = vmul.f32 0.6931472, %v189_v29  ;;  %v191_v31 = vpop.eup %190 }
 0x5d2   :  { %192 = vlog2.f32 %v167_v28  ;;  %v158_v33 = vmul.f32 0.6931472, %v191_v31 }
 0x5d3   :  { %v148_v32 = vsel %vm141_vm11, %v140_v10, %v147_v30 }
 0x5d4   :  { %v150_v35 = vsel %vm149_vm12, %v148_v32, 0.0  ;;  %v159_v37 = vsel %vm152_vm14, %v151_v13, %v158_v33 }
 0x5d5   :  { %v161_v38 = vsel %vm160_vm13, %v159_v37, %v150_v35 }
 0x5df   :  { %v193_v34 = vpop.eup %192 }
 0x5e0   :  { %v169_v36 = vmul.f32 0.6931472, %v193_v34 }
 0x5e2   :  { %v170_v39 = vsel %vm163_vm0, %v162_v20, %v169_v36 }
 0x5e3   :  { %v172_v40 = vsel %vm171_vm15, %v170_v39, %v161_v38 }
 0x5e4   :  { %173 = vst [vmem:[%s303_s2] sm:$0xff] %v172_v40 }
 0x5e5   :  { %178 = vsyncpa [#allocation3], 1 }
 0x5e6   :  { %179 = vsyncpa [#allocation5], 1 }

</bundles_post_ra>
